<compile_context>
chip_gen: v5e
topology: v5e:2x2
jax: 0.10.0
libtpu: 0.0.40
codegen_flags: <defaults>
</compile_context>

<pallas_src>
import jax
import jax.numpy as jnp
from jax.experimental import pallas as pl
from jax.experimental.pallas import tpu as pltpu

NEG_SLOPE = 0.01
BN_EPS = 1e-5
KH = KW = 3  # 3x3 conv, stride 1, padding 1, dilation 1


def conv_dropout_norm_nonlin(x_nchw, w_oihw, bias, gamma, beta, running_mean, running_var):
    """Forward pass of ConvDropoutNormNonlin (inference). Input/output are NCHW."""
    N, Cin, H, W = x_nchw.shape
    Cout = w_oihw.shape[0]
    HW = H * W
    K = KH * KW * Cin
    # Row-flattened padded scratch length: (H+2) rows of width W flattened onto lanes,
    # plus one extra zero lane on each end so every tap offset dy*W + dx .. + HW is in
    # bounds:  xz[ci, W + 1 + r*W + c] == x[ci, r, c].
    L = (H + 2) * W + 2

    def kernel(x_ref, w_ref, shift_ref, o_ref, xz_ref, xcol_ref):
        # --- padded-row scratch: zero ONLY the halo lanes, write the interior once ---
        xz_ref[:, 0:W + 1] = jnp.zeros((Cin, W + 1), jnp.float32)
        xz_ref[:, W + 1 + HW:L] = jnp.zeros((Cin, W + 1), jnp.float32)
        xz_ref[:, W + 1:W + 1 + HW] = x_ref[0].astype(jnp.float32)

        # Column index of every output pixel (hoisted; used only for the edge masks).
        col = jax.lax.broadcasted_iota(jnp.int32, (Cin, HW), 1) % W
        left_edge = col == 0          # dx == 0 taps would read the previous row's last pixel
        right_edge = col == W - 1     # dx == 2 taps would read the next row's first pixel

        # --- im2col: stack the 9 taps along the contraction axis (masks applied here) ---
        for dy in range(KH):
            for dx in range(KW):
                t = dy * KW + dx
                off = dy * W + dx
                tap = xz_ref[:, off:off + HW]                      # (Cin, HW), static slice
                if dx == 0:
                    tap = jnp.where(left_edge, 0.0, tap)
                elif dx == KW - 1:
                    tap = jnp.where(right_edge, 0.0, tap)
                xcol_ref[t * Cin:(t + 1) * Cin, :] = tap

        # --- single MXU matmul: (Cout, 9*Cin) @ (9*Cin, HW), f32 accumulation ---
        acc = jnp.dot(w_ref[...], xcol_ref[...], preferred_element_type=jnp.float32)

        # BN scale already folded into the weights; only the per-channel shift remains.
        y = acc + shift_ref[...]
        # LeakyReLU(0.01) without a select; lane-dense (Cout, HW) store.
        o_ref[0] = jnp.maximum(y, NEG_SLOPE * y).astype(o_ref.dtype)

    # --- wrapper glue: only free reshapes on activations + tiny parameter prep ---
    x_flat = x_nchw.reshape(N, Cin, HW)                                        # free (contiguous)
    scale = (gamma * jax.lax.rsqrt(running_var + BN_EPS)).astype(jnp.float32)  # (Cout,)
    # (Cout, 9*Cin) with index [co, (dy*KW+dx)*Cin + ci]; BN scale folded in (f32 fold).
    w2 = jnp.transpose(w_oihw, (0, 2, 3, 1)).reshape(Cout, K).astype(jnp.float32)
    w2 = w2 * scale[:, None]
    # shift = beta + (conv_bias - running_mean) * scale   (per output channel)
    shift = ((bias - running_mean) * scale + beta).astype(jnp.float32).reshape(Cout, 1)

    out_flat = pl.pallas_call(
        kernel,
        out_shape=jax.ShapeDtypeStruct((N, Cout, HW), x_nchw.dtype),
        grid=(N,),
        in_specs=[
            pl.BlockSpec((1, Cin, HW), lambda n: (n, 0, 0)),
            pl.BlockSpec((Cout, K), lambda n: (0, 0)),
            pl.BlockSpec((Cout, 1), lambda n: (0, 0)),
        ],
        out_specs=pl.BlockSpec((1, Cout, HW), lambda n: (n, 0, 0)),
        scratch_shapes=[
            pltpu.VMEM((Cin, L), jnp.float32),     # padded-row image (row halo + end lanes)
            pltpu.VMEM((K, HW), jnp.float32),      # im2col stacked taps
        ],
        compiler_params=pltpu.CompilerParams(dimension_semantics=("parallel",)),
    )(x_flat, w2, shift)

    return out_flat.reshape(N, Cout, H, W)                                     # free (contiguous)


def reference_forward(x_nchw, w_oihw, bias, gamma, beta, running_mean, running_var):
    """Plain-JAX reference (XLA conv, HIGHEST precision) with identical eval semantics."""
    y = jax.lax.conv_general_dilated(
        x_nchw, w_oihw, window_strides=(1, 1), padding=((1, 1), (1, 1)),
        dimension_numbers=("NCHW", "OIHW", "NCHW"),
        precision=jax.lax.Precision.HIGHEST)
    y = y + bias[None, :, None, None]
    y = (y - running_mean[None, :, None, None]) * jax.lax.rsqrt(
        running_var[None, :, None, None] + BN_EPS)
    y = y * gamma[None, :, None, None] + beta[None, :, None, None]
    return jnp.where(y >= 0, y, NEG_SLOPE * y)


if __name__ == "__main__":
    # small shapes consistent with the module: Conv2d(Cin=4 -> Cout=8, 3x3, pad 1)
    N, Cin, Cout, H, W = 2, 4, 8, 16, 16

    key = jax.random.PRNGKey(0)
    kx, kw, kb, kg, kbe, km, kv = jax.random.split(key, 7)

    x = jax.random.normal(kx, (N, Cin, H, W), dtype=jnp.float32)
    conv_w = 0.1 * jax.random.normal(kw, (Cout, Cin, KH, KW), dtype=jnp.float32)
    conv_b = 0.1 * jax.random.normal(kb, (Cout,), dtype=jnp.float32)
    gamma = 1.0 + 0.1 * jax.random.normal(kg, (Cout,), dtype=jnp.float32)
    beta = 0.1 * jax.random.normal(kbe, (Cout,), dtype=jnp.float32)
    running_mean = 0.05 * jax.random.normal(km, (Cout,), dtype=jnp.float32)
    running_var = jax.random.uniform(kv, (Cout,), dtype=jnp.float32,
                                     minval=0.5, maxval=1.5)

    out = conv_dropout_norm_nonlin(x, conv_w, conv_b, gamma, beta,
                                   running_mean, running_var)
    out = jax.block_until_ready(out)

    ref = reference_forward(x, conv_w, conv_b, gamma, beta, running_mean, running_var)
    ref = jax.block_until_ready(ref)

    assert out.shape == (N, Cout, H, W), out.shape
    max_err = float(jnp.max(jnp.abs(out - ref)))
    # Default MXU precision (single-pass bf16 multiplies) vs the HIGHEST-precision XLA
    # reference: bf16-level error is expected and accepted deliberately (perf review).
    assert jnp.allclose(out, ref, atol=2e-2, rtol=2e-2), max_err

    print("KERNEL_OK")
</pallas_src>

<mosaic_0001>
module attributes {stable_mosaic.version = 11 : i64} {
  func.func @kernel(%arg0: i32, %arg1: memref<1x4x256xf32, #tpu.memory_space<vmem>>, %arg2: memref<8x36xf32, #tpu.memory_space<vmem>>, %arg3: memref<8x1xf32, #tpu.memory_space<vmem>>, %arg4: memref<1x8x256xf32, #tpu.memory_space<vmem>>, %arg5: memref<4x290xf32, #tpu.memory_space<vmem>>, %arg6: memref<36x256xf32, #tpu.memory_space<vmem>>) attributes {dimension_semantics = [#tpu.dimension_semantics<parallel>], iteration_bounds = array<i64: 2>, scalar_prefetch = 0 : i64, scratch_operands = 2 : i64, tpu.core_type = #tpu.core_type<tc>, window_params = [{transform_indices = @transform_0, window_bounds = array<i64: 1, 4, 256>}, {pipeline_mode = #tpu.pipeline_mode<synchronous>, transform_indices = @transform_1, window_bounds = array<i64: 8, 36>}, {pipeline_mode = #tpu.pipeline_mode<synchronous>, transform_indices = @transform_2, window_bounds = array<i64: 8, 1>}, {transform_indices = @transform_3, window_bounds = array<i64: 1, 8, 256>}]} {
    %cst = arith.constant 0.000000e+00 : f32
    %0 = vector.broadcast %cst : f32 to vector<4x17xf32>
    %c0 = arith.constant 0 : index
    %c0_0 = arith.constant 0 : index
    %1 = vector.load %arg5[%c0, %c0_0] : memref<4x290xf32, #tpu.memory_space<vmem>>, vector<4x17xf32>
    tpu.vector_store %arg5[%c0, %c0_0], %0 {strides = array<i32>} : memref<4x290xf32, #tpu.memory_space<vmem>>, vector<4x17xf32>,
    %cst_1 = arith.constant 0.000000e+00 : f32
    %2 = vector.broadcast %cst_1 : f32 to vector<4x17xf32>
    %c0_2 = arith.constant 0 : index
    %c273 = arith.constant 273 : index
    %3 = vector.load %arg5[%c0_2, %c273] : memref<4x290xf32, #tpu.memory_space<vmem>>, vector<4x17xf32>
    tpu.vector_store %arg5[%c0_2, %c273], %2 {strides = array<i32>} : memref<4x290xf32, #tpu.memory_space<vmem>>, vector<4x17xf32>,
    %c0_3 = arith.constant 0 : index
    %c0_4 = arith.constant 0 : index
    %c0_5 = arith.constant 0 : index
    %4 = vector.load %arg1[%c0_3, %c0_4, %c0_5] : memref<1x4x256xf32, #tpu.memory_space<vmem>>, vector<1x4x256xf32>
    %5 = vector.shape_cast %4 : vector<1x4x256xf32> to vector<4x256xf32>
    %c0_6 = arith.constant 0 : index
    %c17 = arith.constant 17 : index
    %6 = vector.load %arg5[%c0_6, %c17] : memref<4x290xf32, #tpu.memory_space<vmem>>, vector<4x256xf32>
    tpu.vector_store %arg5[%c0_6, %c17], %5 {strides = array<i32>} : memref<4x290xf32, #tpu.memory_space<vmem>>, vector<4x256xf32>,
    %7 = tpu.iota {dimensions = array<i32: 1>} : vector<4x256xi32>
    %c16_i32 = arith.constant 16 : i32
    %c0_i32 = arith.constant 0 : i32
    %8 = arith.cmpi eq, %c16_i32, %c0_i32 : i32
    %c1_i32 = arith.constant 1 : i32
    %9 = arith.select %8, %c1_i32, %c16_i32 : i32
    %10 = vector.broadcast %9 : i32 to vector<4x256xi32>
    %11 = arith.remsi %7, %10 : vector<4x256xi32>
    %c0_i32_7 = arith.constant 0 : i32
    %12 = vector.broadcast %c0_i32_7 : i32 to vector<4x256xi32>
    %13 = arith.cmpi ne, %11, %12 : vector<4x256xi32>
    %c0_i32_8 = arith.constant 0 : i32
    %14 = vector.broadcast %c0_i32_8 : i32 to vector<4x256xi32>
    %15 = arith.cmpi slt, %11, %14 : vector<4x256xi32>
    %c0_i32_9 = arith.constant 0 : i32
    %16 = arith.cmpi slt, %9, %c0_i32_9 : i32
    %17 = vector.broadcast %16 : i1 to vector<4x256xi1>
    %18 = vector.broadcast %17 : vector<4x256xi1> to vector<4x256xi1>
    %19 = arith.xori %15, %18 : vector<4x256xi1>
    %20 = arith.andi %19, %13 : vector<4x256xi1>
    %21 = vector.broadcast %9 : i32 to vector<4x256xi32>
    %22 = arith.addi %11, %21 : vector<4x256xi32>
    %23 = arith.select %20, %22, %11 : vector<4x256xi1>, vector<4x256xi32>
    %c0_i32_10 = arith.constant 0 : i32
    %24 = vector.broadcast %c0_i32_10 : i32 to vector<4x256xi32>
    %25 = arith.cmpi eq, %23, %24 : vector<4x256xi32>
    %c15_i32 = arith.constant 15 : i32
    %26 = vector.broadcast %c15_i32 : i32 to vector<4x256xi32>
    %27 = arith.cmpi eq, %23, %26 : vector<4x256xi32>
    %c0_11 = arith.constant 0 : index
    %c0_12 = arith.constant 0 : index
    %28 = vector.load %arg5[%c0_11, %c0_12] : memref<4x290xf32, #tpu.memory_space<vmem>>, vector<4x256xf32>
    %cst_13 = arith.constant 0.000000e+00 : f32
    %29 = vector.broadcast %cst_13 : f32 to vector<4x256xf32>
    %30 = arith.select %25, %29, %28 : vector<4x256xi1>, vector<4x256xf32>
    %c0_14 = arith.constant 0 : index
    %c0_15 = arith.constant 0 : index
    %31 = vector.load %arg6[%c0_14, %c0_15] : memref<36x256xf32, #tpu.memory_space<vmem>>, vector<4x256xf32>
    tpu.vector_store %arg6[%c0_14, %c0_15], %30 {strides = array<i32>} : memref<36x256xf32, #tpu.memory_space<vmem>>, vector<4x256xf32>,
    %c0_16 = arith.constant 0 : index
    %c1 = arith.constant 1 : index
    %32 = vector.load %arg5[%c0_16, %c1] : memref<4x290xf32, #tpu.memory_space<vmem>>, vector<4x256xf32>
    %c4 = arith.constant 4 : index
    %c0_17 = arith.constant 0 : index
    %33 = vector.load %arg6[%c4, %c0_17] : memref<36x256xf32, #tpu.memory_space<vmem>>, vector<4x256xf32>
    tpu.vector_store %arg6[%c4, %c0_17], %32 {strides = array<i32>} : memref<36x256xf32, #tpu.memory_space<vmem>>, vector<4x256xf32>,
    %c0_18 = arith.constant 0 : index
    %c2 = arith.constant 2 : index
    %34 = vector.load %arg5[%c0_18, %c2] : memref<4x290xf32, #tpu.memory_space<vmem>>, vector<4x256xf32>
    %cst_19 = arith.constant 0.000000e+00 : f32
    %35 = vector.broadcast %cst_19 : f32 to vector<4x256xf32>
    %36 = arith.select %27, %35, %34 : vector<4x256xi1>, vector<4x256xf32>
    %c8 = arith.constant 8 : index
    %c0_20 = arith.constant 0 : index
    %37 = vector.load %arg6[%c8, %c0_20] : memref<36x256xf32, #tpu.memory_space<vmem>>, vector<4x256xf32>
    tpu.vector_store %arg6[%c8, %c0_20], %36 {strides = array<i32>} : memref<36x256xf32, #tpu.memory_space<vmem>>, vector<4x256xf32>,
    %c0_21 = arith.constant 0 : index
    %c16 = arith.constant 16 : index
    %38 = vector.load %arg5[%c0_21, %c16] : memref<4x290xf32, #tpu.memory_space<vmem>>, vector<4x256xf32>
    %cst_22 = arith.constant 0.000000e+00 : f32
    %39 = vector.broadcast %cst_22 : f32 to vector<4x256xf32>
    %40 = arith.select %25, %39, %38 : vector<4x256xi1>, vector<4x256xf32>
    %c12 = arith.constant 12 : index
    %c0_23 = arith.constant 0 : index
    %41 = vector.load %arg6[%c12, %c0_23] : memref<36x256xf32, #tpu.memory_space<vmem>>, vector<4x256xf32>
    tpu.vector_store %arg6[%c12, %c0_23], %40 {strides = array<i32>} : memref<36x256xf32, #tpu.memory_space<vmem>>, vector<4x256xf32>,
    %c0_24 = arith.constant 0 : index
    %c17_25 = arith.constant 17 : index
    %42 = vector.load %arg5[%c0_24, %c17_25] : memref<4x290xf32, #tpu.memory_space<vmem>>, vector<4x256xf32>
    %c16_26 = arith.constant 16 : index
    %c0_27 = arith.constant 0 : index
    %43 = vector.load %arg6[%c16_26, %c0_27] : memref<36x256xf32, #tpu.memory_space<vmem>>, vector<4x256xf32>
    tpu.vector_store %arg6[%c16_26, %c0_27], %42 {strides = array<i32>} : memref<36x256xf32, #tpu.memory_space<vmem>>, vector<4x256xf32>,
    %c0_28 = arith.constant 0 : index
    %c18 = arith.constant 18 : index
    %44 = vector.load %arg5[%c0_28, %c18] : memref<4x290xf32, #tpu.memory_space<vmem>>, vector<4x256xf32>
    %cst_29 = arith.constant 0.000000e+00 : f32
    %45 = vector.broadcast %cst_29 : f32 to vector<4x256xf32>
    %46 = arith.select %27, %45, %44 : vector<4x256xi1>, vector<4x256xf32>
    %c20 = arith.constant 20 : index
    %c0_30 = arith.constant 0 : index
    %47 = vector.load %arg6[%c20, %c0_30] : memref<36x256xf32, #tpu.memory_space<vmem>>, vector<4x256xf32>
    tpu.vector_store %arg6[%c20, %c0_30], %46 {strides = array<i32>} : memref<36x256xf32, #tpu.memory_space<vmem>>, vector<4x256xf32>,
    %c0_31 = arith.constant 0 : index
    %c32 = arith.constant 32 : index
    %48 = vector.load %arg5[%c0_31, %c32] : memref<4x290xf32, #tpu.memory_space<vmem>>, vector<4x256xf32>
    %cst_32 = arith.constant 0.000000e+00 : f32
    %49 = vector.broadcast %cst_32 : f32 to vector<4x256xf32>
    %50 = arith.select %25, %49, %48 : vector<4x256xi1>, vector<4x256xf32>
    %c24 = arith.constant 24 : index
    %c0_33 = arith.constant 0 : index
    %51 = vector.load %arg6[%c24, %c0_33] : memref<36x256xf32, #tpu.memory_space<vmem>>, vector<4x256xf32>
    tpu.vector_store %arg6[%c24, %c0_33], %50 {strides = array<i32>} : memref<36x256xf32, #tpu.memory_space<vmem>>, vector<4x256xf32>,
    %c0_34 = arith.constant 0 : index
    %c33 = arith.constant 33 : index
    %52 = vector.load %arg5[%c0_34, %c33] : memref<4x290xf32, #tpu.memory_space<vmem>>, vector<4x256xf32>
    %c28 = arith.constant 28 : index
    %c0_35 = arith.constant 0 : index
    %53 = vector.load %arg6[%c28, %c0_35] : memref<36x256xf32, #tpu.memory_space<vmem>>, vector<4x256xf32>
    tpu.vector_store %arg6[%c28, %c0_35], %52 {strides = array<i32>} : memref<36x256xf32, #tpu.memory_space<vmem>>, vector<4x256xf32>,
    %c0_36 = arith.constant 0 : index
    %c34 = arith.constant 34 : index
    %54 = vector.load %arg5[%c0_36, %c34] : memref<4x290xf32, #tpu.memory_space<vmem>>, vector<4x256xf32>
    %cst_37 = arith.constant 0.000000e+00 : f32
    %55 = vector.broadcast %cst_37 : f32 to vector<4x256xf32>
    %56 = arith.select %27, %55, %54 : vector<4x256xi1>, vector<4x256xf32>
    %c32_38 = arith.constant 32 : index
    %c0_39 = arith.constant 0 : index
    %57 = vector.load %arg6[%c32_38, %c0_39] : memref<36x256xf32, #tpu.memory_space<vmem>>, vector<4x256xf32>
    tpu.vector_store %arg6[%c32_38, %c0_39], %56 {strides = array<i32>} : memref<36x256xf32, #tpu.memory_space<vmem>>, vector<4x256xf32>,
    %c0_40 = arith.constant 0 : index
    %c0_41 = arith.constant 0 : index
    %58 = vector.load %arg2[%c0_40, %c0_41] : memref<8x36xf32, #tpu.memory_space<vmem>>, vector<8x36xf32>
    %c0_42 = arith.constant 0 : index
    %c0_43 = arith.constant 0 : index
    %59 = vector.load %arg6[%c0_42, %c0_43] : memref<36x256xf32, #tpu.memory_space<vmem>>, vector<36x256xf32>
    %cst_44 = arith.constant dense<0.000000e+00> : vector<8x256xf32>
    %60 = tpu.matmul %58, %59, %cst_44 {dimension_numbers = #tpu.dot_dimension_numbers<[1], [0], [0], [1], [0, 0, 1, 1], [], []>} : vector<8x36xf32>, vector<36x256xf32>, vector<8x256xf32> -> vector<8x256xf32>
    %c0_45 = arith.constant 0 : index
    %c0_46 = arith.constant 0 : index
    %61 = vector.load %arg3[%c0_45, %c0_46] : memref<8x1xf32, #tpu.memory_space<vmem>>, vector<8x1xf32>
    %62 = vector.broadcast %61 : vector<8x1xf32> to vector<8x256xf32>
    %63 = arith.addf %60, %62 : vector<8x256xf32>
    %cst_47 = arith.constant 0.00999999977 : f32
    %64 = vector.broadcast %cst_47 : f32 to vector<8x256xf32>
    %65 = arith.mulf %64, %63 : vector<8x256xf32>
    %66 = arith.maximumf %63, %65 : vector<8x256xf32>
    %c0_48 = arith.constant 0 : index
    %c0_49 = arith.constant 0 : index
    %c0_50 = arith.constant 0 : index
    %67 = vector.load %arg4[%c0_48, %c0_49, %c0_50] : memref<1x8x256xf32, #tpu.memory_space<vmem>>, vector<1x8x256xf32>
    %68 = vector.shape_cast %67 : vector<1x8x256xf32> to vector<8x256xf32>
    %69 = vector.shape_cast %66 : vector<8x256xf32> to vector<1x8x256xf32>
    tpu.vector_store %arg4[%c0_48, %c0_49, %c0_50], %69 {strides = array<i32>} : memref<1x8x256xf32, #tpu.memory_space<vmem>>, vector<1x8x256xf32>,
    return
  }
  func.func @transform_0(%arg0: i32) -> (i32, i32, i32) {
    %c0_i32 = arith.constant 0 : i32
    %c0_i32_0 = arith.constant 0 : i32
    %c0_i32_1 = arith.constant 0 : i32
    return %arg0, %c0_i32, %c0_i32_0 : i32, i32, i32
  }
  func.func @transform_1(%arg0: i32) -> (i32, i32) {
    %c0_i32 = arith.constant 0 : i32
    %c0_i32_0 = arith.constant 0 : i32
    %c0_i32_1 = arith.constant 0 : i32
    return %c0_i32, %c0_i32_0 : i32, i32
  }
  func.func @transform_2(%arg0: i32) -> (i32, i32) {
    %c0_i32 = arith.constant 0 : i32
    %c0_i32_0 = arith.constant 0 : i32
    %c0_i32_1 = arith.constant 0 : i32
    return %c0_i32, %c0_i32_0 : i32, i32
  }
  func.func @transform_3(%arg0: i32) -> (i32, i32, i32) {
    %c0_i32 = arith.constant 0 : i32
    %c0_i32_0 = arith.constant 0 : i32
    %c0_i32_1 = arith.constant 0 : i32
    return %arg0, %c0_i32, %c0_i32_0 : i32, i32, i32
  }
}

</mosaic_0001>

<bundles_post_ra>
// kernel: tpu_custom_call.1
= control target key start
LH: loop header
LB: loop body
LE: loop exit
PB: predicated region body
PF: predicated region fallthrough
CT: control target
= control target key end

     0   :  { %8 = vsyncpa [#allocation5], 0  ;;  %s1048_s0 = inlined_call_operand.hbm [shape: f32[2,4,256], index: 0, kind: input, shape index: {}]   ;;  %s1049_s1 = inlined_call_operand.vmem [shape: f32[8,36], index: 1, kind: input, shape index: {}]   ;;  %s1050_s2 = inlined_call_operand.vmem [shape: f32[8,1], index: 2, kind: input, shape index: {}]   ;;  %s1051_s3 = inlined_call_operand.hbm [shape: f32[2,8,256], index: 3, kind: output, shape index: {}]  }
   0x1   :  { %10 = vsyncpa [#allocation5 + $0x1], 0 }
   0x2   :  { %11 = vsyncpa [#allocation6], 0 }
   0x3   :  { %13 = vsyncpa [#allocation6 + $0x1], 0  ;;  %s826_s12 = smov 0   ;;  %s828_s13 = smov 0  }
   0x4   :  { %s830_s14 = smov 0   ;;  %s832_s15 = smov 0  }
   0x5 LB: > { %s847_s16 = sadd.s32 4294967295, %s793_s15   ;;  %s618_s17 = sadd.s32 4294967294, %s793_s15   ;;  %s793_s15 = sphi %s832_s15, %s1069_s15   ;;  %s789_s14 = sphi %s830_s14, %s1068_s14   ;;  %s785_s13 = sphi %s828_s13, %s1067_s13   ;;  %s781_s12 = sphi %s826_s12, %s1066_s12  }
   0x6   : > { %s851_s18 = sadd.s32 1, %s793_s15   ;;  %s26_s19 = sadd.s32 1, %s789_s14 }
   0x7   : > { %s23_s20 = ssub.s32 %s793_s15, %s851_s18  ;;  %p33_p0 = scmp.ne.s32.totalorder %s789_s14, %s785_s13 }
   0x8   : > { %p24_p1 = scmp.eq.s32.totalorder %s23_s20, 0  ;;  %p34_p2 = scmp.eq.s32.totalorder %s793_s15, 0 }
   0x9   : > { %p39_p3 = scmp.ne.s32.totalorder %s785_s13, %s781_s12  ;;  %p40_p4 = scmp.eq.s32.totalorder %s847_s16, 0 }
   0xa   : > { %s863_s21 = scalar_select %p24_p1, %s789_s14, %s26_s19  }
   0xb   : > { %p865_p5 = por %p34_p2, %p33_p0  ;;  %p869_p6 = por %p40_p4, %p39_p3 }
   0xc   : > { %p105_p7 = scmp.eq.s32.totalorder %s847_s16, 1  ;;  %p111_p8 = scmp.eq.s32.totalorder %s618_s17, 1 }
   0xd   : > { %p650_p10 = scmp.lt.s32.totalorder %s793_s15, 2  ;;  %s137_s26 = sand.u32 1, %s789_s14  }
   0xe   : > { %p876_p11 = por %p105_p7, %p33_p0  ;;  %p880_p12 = por %p111_p8, %p39_p3 }
   0xf   : > { %s636_s27 = sshll.u32 %s793_s15, 3  ;;  %s621_s28 = sshll.u32 %s137_s26, 3 }
  0x10   : > { %s146_s4 = scalar_lea.hbm %s1048_s0, %s636_s27  ;;  %s141_s6 = scalar_lea.vmem [#allocation4], %s621_s28 }
  0x11   : > { %s148_s5 = sshll.u32 %s146_s4, 4  ;;  %s150_s7 = sshll.u32 %s141_s6, 4  ;;  %s149_s5 = int_to_ptr.hbm [resolvable:$true] %s148_s5  ;;  %s151_s7 = int_to_ptr.vmem [resolvable:$true] %s150_s7 }
  0x12   : > { %p891_p13 = pnand %p650_p10, %p865_p5  ;;  %p624_p0 = scmp.ge.s32.totalorder %s793_s15, 1 }
  0x13   : > { %p155_p1 = scmp.lt.s32.totalorder %s793_s15, 3  ;;  %s138_s9 = scalar_lea.sflag [#allocation5], %s137_s26 }
  0x14   : > { %s697_s10 = sshra.s32 %s149_s5, 4  ;;  %p701_p3 = pneg %p891_p13  ;;  %s698_s10 = int_to_ptr.hbm [resolvable:$true] %s697_s10 }
  0x15   : > { %s699_s11 = scalar_lea.hbm %s698_s10, 8  ;;  %s704_s20 = scalar_lea.hbm %s1048_s0, 16 }
  0x16   : > { %p700_p2 = scmp.ne.s32.totalorder %s698_s10, %s699_s11  ;;  %p705_p5 = scmp.lt.s32.totalorder %s698_s10, %s1048_s0 }
  0x17   : > { %p706_p8 = scmp.lt.s32.totalorder %s704_s20, %s699_s11 }
  0x18   : > { %p702_p4 = pnand %p701_p3, %p700_p2 }
  0x19   : > { %p707_p10 = por %p706_p8, %p705_p5 }
  0x1a   : > { %p703_p7 = pneg %p702_p4 }
  0x1c   : > { %p708_p9 = pnand %p707_p10, %p703_p7 }
  0x1e   : > { %711 = shalt.err (!%p708_p9)
}
  0x1f   : > { %645 = dma.hbm_to_vmem [thread:$0]  (!%p891_p13), %s149_s5, 128, %s151_s7, %s138_s9  }
  0x20   : > { %p156_p2 = pnand %p624_p0, %p155_p1 }
  0x21   : > { %s912_s26 = sand.u32 (!%p156_p2), 1, %s785_s13  }
  0x22   : > { %159 = sbr.rel (%p156_p2) target bundleno = 524 (0x20c), region = 32  ;;  %s625_s28 = sshll.u32 (!%p156_p2), %s912_s26, 3 }
  0x23   : > { %s162_s29 = scalar_lea.sflag (!%p156_p2), [#allocation5], %s912_s26  ;;  %s165_s30 = scalar_lea.vmem (!%p156_p2), [#allocation4], %s625_s28 }
  0x27   : > { %772 = dma.done.wait (%p869_p6), %s162_s29, 128  }
  0x28   : > { %774 = vsyncadd (%p869_p6), %s162_s29, 4294967168  ;;  %vm189_vm0 = vcmask 134144   ;;  %vm191_vm1 = vcmask 273544   ;;  %v795_v0 = vmov 0.0   ;;  %v193_v1 = vld [vmem:[%s165_s30] sm:$0xff]  ;;  %s796_s4 = smov 17   ;;  %v207_v4 = vlaneseq }
  0x29   : > { %190 = vst.msk [vmem:[#allocation2] sm:$0xf] %vm189_vm0, %v795_v0  ;;  %195 = vrot.lane.b32.xlu0 %v193_v1, %s796_s4  ;;  %vm202_vm2 = vcmask 1043592   ;;  %vm203_vm3 = vcmask 1047556   ;;  %vm198_vm4 = vcmask 138240   ;;  %s797_s23 = smov 112  }
  0x2a   : > { %192 = vst.msk [vmem:[#allocation2 + $0x8] sm:$0xf] %vm191_vm1, %v795_v0  ;;  %vm204_vm5 = vmor %vm203_vm3, %vm202_vm2  ;;  %v922_v6 = vand.u32 127, %v207_v4  ;;  %s798_s5 = smov 111   ;;  %s799_s6 = smov 110   ;;  %vm314_vm8 = vcmask 916480  }
  0x2b   : > { %s800_s7 = smov 96   ;;  %s801_s8 = smov 95   ;;  %vm345_vm9 = vcmask 908288   ;;  %vm368_vm10 = vcmask 900096   ;;  %vm399_vm13 = vcmask 785408   ;;  %vm425_vm14 = vcmask 777216  }
  0x2c   : > { %v925_v8 = vadd.s32 128, %v922_v6  ;;  %v214_v10 = vand.u32 15, %v922_v6  ;;  %s802_s9 = smov 94   ;;  %s803_s10 = smov 126   ;;  %v468_v15 = vld [vmem:[%s1050_s2] sm:$0xff]  ;;  %vm448_vm15 = vcmask 769024  }
  0x2d   : > { %s804_s11 = smov 127   ;;  %vm266_vm1 = vcmask 1039360   ;;  %vm478_vm2 = vcmask 1043456   ;;  %vm474_vm3 = vcmask 293888   ;;  %s626_s27 = sshll.u32 %s912_s26, 4 }
  0x2e   : > { %v221_v11 = vand.u32 15, %v925_v8  ;;  %vm934_vm6 = vcmp.eq.s32.totalorder %v214_v10, 0  ;;  %vm973_vm11 = vcmp.eq.s32.totalorder %v214_v10, 15  ;;  %s637_s28 = sshll.u32 %s847_s16, 4 }
  0x2f   : > { %s543_s4 = scalar_lea.hbm %s1051_s3, %s637_s28 }
  0x30   : > { %vm942_vm7 = vcmp.eq.s32.totalorder %v221_v11, 0  ;;  %vm984_vm12 = vcmp.eq.s32.totalorder %v221_v11, 15 }
  0x9b   : > { %v196_v2 = vpop.permute.xlu0 %195 }
  0x9c   : > { %v197_v3 = vrot.slane %v196_v2, 4 }
  0x9e   : > { %v199_v5 = vsel %vm198_vm4, %v197_v3, %v196_v2  ;;  %206 = vst.msk [vmem:[#allocation2 + $0x8] sm:$0xf] %vm189_vm0, %v197_v3  ;;  %vm289_vm0 = vcmask 1031168  }
  0x9f   : > { %205 = vst.msk [vmem:[#allocation2] sm:$0xff] %vm204_vm5, %v199_v5 }
  0xa5   : > { %v250_v7 = vld [vmem:[#allocation2 + $0x8] sm:$0xf] }
  0xa6   : > { %v927_v9 = vld [vmem:[#allocation2] sm:$0xff]  ;;  %256 = vst [vmem:[#allocation1 + $0x11] ss:$2 sm:$0xff] %v250_v7  ;;  %v274_v14 = vld [vmem:[#allocation2 + $0x8] sm:$0xf] }
  0xa7   : > { %240 = vst [vmem:[#allocation1] ss:$2 sm:$0xff] %v927_v9  ;;  %v299_v21 = vld [vmem:[#allocation2 + $0x8] sm:$0xf] }
  0xa8   : > { %v330_v25 = vld [vmem:[#allocation2 + $0x8] sm:$0xf] }
  0xa9   : > { %v353_v29 = vld [vmem:[#allocation2 + $0x8] sm:$0xf] }
  0xaa   : > { %v384_v33 = vld [vmem:[#allocation2 + $0x8] sm:$0xf] }
  0xab   : > { %v409_v36 = vld [vmem:[#allocation2 + $0x8] sm:$0xf] }
  0xac   : > { %v433_v40 = vld [vmem:[#allocation2 + $0x8] sm:$0xf] }
  0xad   : > { %v938_v13 = vld.sshfl [vmem:[#allocation1 + $0x10] sm:$0xff pattern:$0x75316420] }
  0xae   : > { %279 = vst [vmem:[#allocation1 + $0x10] ss:$2 sm:$0xff] %v274_v14  ;;  %v241_v16 = vld.sshfl [vmem:[#allocation1] sm:$0xff pattern:$0x75316420] }
  0xaf   : > { %v242_v17 = vld.sshfl [vmem:[#allocation1 + $0x8] sm:$0xff pattern:$0x75316420]  ;;  %v245_v18 = vsel %vm934_vm6, 0.0, %v241_v16 }
  0xb0   : > { %254 = vst [vmem:[#allocation1 + $0x1] ss:$2 sm:$0xff] %v927_v9  ;;  %v246_v19 = vsel %vm942_vm7, 0.0, %v242_v17 }
  0xb1   : > { %248 = vst [vmem:[#allocation3] sm:$0xf] %v246_v19 }
  0xb2   : > { %247 = vst [vmem:[#allocation3 + $0x30] sm:$0xf] %v245_v18 }
  0xb5   : > { %v951_v20 = vld.sshfl [vmem:[#allocation1 + $0x10] sm:$0xff pattern:$0x75316420] }
  0xb6   : > { %304 = vst [vmem:[#allocation1 + $0x10] ss:$2 sm:$0xff] %v299_v21 }
  0xb7   : > { %v953_v22 = vld.sshfl [vmem:[#allocation1] sm:$0xff pattern:$0x75316420]  ;;  %v955_v23 = vld.sshfl [vmem:[#allocation1 + $0x8] sm:$0xff pattern:$0x75316420] }
  0xb8   : > { %277 = vst [vmem:[#allocation1] ss:$2 sm:$0xff] %v927_v9 }
  0xbd   : > { %v307_v24 = vld.sshfl [vmem:[#allocation1 + $0x10] sm:$0xff pattern:$0x75316420] }
  0xbe   : > { %312 = vrot.lane.b32.xlu0 %v307_v24, %s797_s23  ;;  %335 = vst [vmem:[#allocation1 + $0x10] ss:$2 sm:$0xff] %v330_v25 }
  0xbf   : > { %v280_v26 = vld.sshfl [vmem:[#allocation1] sm:$0xff pattern:$0x75316420]  ;;  %v281_v27 = vld.sshfl [vmem:[#allocation1 + $0x8] sm:$0xff pattern:$0x75316420] }
  0xc0   : > { %302 = vst [vmem:[#allocation1] ss:$2 sm:$0xff] %v927_v9 }
  0xc5   : > { %v338_v28 = vld.sshfl [vmem:[#allocation1 + $0x10] sm:$0xff pattern:$0x75316420] }
  0xc6   : > { %343 = vrot.lane.b32.xlu0 %v338_v28, %s798_s5  ;;  %358 = vst [vmem:[#allocation1 + $0x10] ss:$2 sm:$0xff] %v353_v29 }
  0xc7   : > { %v306_v30 = vld.sshfl [vmem:[#allocation1 + $0x8] sm:$0xff pattern:$0x75316420]  ;;  %v305_v31 = vld.sshfl [vmem:[#allocation1] sm:$0xff pattern:$0x75316420] }
  0xc8   : > { %310 = vrot.lane.b32.xlu2 %v306_v30, %s797_s23  ;;  %308 = vrot.lane.b32.xlu1 %v305_v31, %s797_s23  ;;  %333 = vst [vmem:[#allocation1] ss:$2 sm:$0xff] %v927_v9  ;;  %s188_s23 = scalar_lea.vmem [#allocation7], %s626_s27 }
  0xcd   : > { %v361_v32 = vld.sshfl [vmem:[#allocation1 + $0x10] sm:$0xff pattern:$0x75316420] }
  0xce   : > { %366 = vrot.lane.b32.xlu0 %v361_v32, %s799_s6  ;;  %389 = vst [vmem:[#allocation1 + $0x10] ss:$2 sm:$0xff] %v384_v33 }
  0xcf   : > { %v337_v34 = vld.sshfl [vmem:[#allocation1 + $0x8] sm:$0xff pattern:$0x75316420]  ;;  %v336_v35 = vld.sshfl [vmem:[#allocation1] sm:$0xff pattern:$0x75316420] }
  0xd0   : > { %341 = vrot.lane.b32.xlu2 %v337_v34, %s798_s5  ;;  %339 = vrot.lane.b32.xlu1 %v336_v35, %s798_s5  ;;  %356 = vst [vmem:[#allocation1] ss:$2 sm:$0xff] %v927_v9  ;;  %s545_s5 = sshll.u32 %s188_s23, 4  ;;  %s546_s5 = int_to_ptr.vmem [resolvable:$true] %s545_s5 }
  0xd5   : > { %v392_v37 = vld.sshfl [vmem:[#allocation1 + $0x10] sm:$0xff pattern:$0x75316420] }
  0xd6   : > { %397 = vrot.lane.b32.xlu0 %v392_v37, %s800_s7  ;;  %415 = vst [vmem:[#allocation1 + $0x11] ss:$2 sm:$0xff] %v409_v36 }
  0xd7   : > { %v359_v38 = vld.sshfl [vmem:[#allocation1] sm:$0xff pattern:$0x75316420]  ;;  %v360_v39 = vld.sshfl [vmem:[#allocation1 + $0x8] sm:$0xff pattern:$0x75316420] }
  0xd8   : > { %362 = vrot.lane.b32.xlu2 %v359_v38, %s799_s6  ;;  %387 = vst [vmem:[#allocation1] ss:$2 sm:$0xff] %v927_v9 }
  0xdd   : > { %v418_v41 = vld.sshfl [vmem:[#allocation1 + $0x10] sm:$0xff pattern:$0x75316420] }
  0xde   : > { %423 = vrot.lane.b32.xlu0 %v418_v41, %s801_s8  ;;  %438 = vst [vmem:[#allocation1 + $0x10] ss:$2 sm:$0xff] %v433_v40 }
  0xdf   : > { %v390_v42 = vld.sshfl [vmem:[#allocation1] sm:$0xff pattern:$0x75316420]  ;;  %v391_v43 = vld.sshfl [vmem:[#allocation1 + $0x8] sm:$0xff pattern:$0x75316420] }
  0xe0   : > { %364 = vrot.lane.b32.xlu2 %v360_v39, %s799_s6  ;;  %393 = vrot.lane.b32.xlu1 %v390_v42, %s800_s7  ;;  %413 = vst [vmem:[#allocation1 + $0x1] ss:$2 sm:$0xff] %v927_v9  ;;  %s547_s6 = sshll.u32 %s543_s4, 4  ;;  %s548_s6 = int_to_ptr.hbm [resolvable:$true] %s547_s6 }
  0xe1   : > { %s741_s16 = sshra.s32 %s548_s6, 4  ;;  %s742_s16 = int_to_ptr.hbm [resolvable:$true] %s741_s16 }
  0xe2   : > { %p748_p0 = scmp.lt.s32.totalorder %s742_s16, %s1051_s3 }
  0xe5   : > { %v441_v44 = vld.sshfl [vmem:[#allocation1 + $0x10] sm:$0xff pattern:$0x75316420] }
  0xe7   : > { %v417_v45 = vld.sshfl [vmem:[#allocation1 + $0x8] sm:$0xff pattern:$0x75316420]  ;;  %v416_v46 = vld.sshfl [vmem:[#allocation1] sm:$0xff pattern:$0x75316420] }
  0xe8   : > { %395 = vrot.lane.b32.xlu2 %v391_v43, %s800_s7  ;;  %446 = vrot.lane.b32.xlu1 %v441_v44, %s802_s9  ;;  %436 = vst [vmem:[#allocation1] ss:$2 sm:$0xff] %v927_v9  ;;  %s532_s7 = scalar_lea.sflag [#allocation6], %s912_s26 }
  0xef   : > { %v439_v47 = vld.sshfl [vmem:[#allocation1] sm:$0xff pattern:$0x75316420]  ;;  %v440_v48 = vld.sshfl [vmem:[#allocation1 + $0x8] sm:$0xff pattern:$0x75316420] }
  0xf0   : > { %421 = vrot.lane.b32.xlu2 %v417_v45, %s801_s8  ;;  %419 = vrot.lane.b32.xlu1 %v416_v46, %s801_s8  ;;  %s743_s8 = scalar_lea.hbm %s742_s16, 16 }
  0xf1   : > { %442 = vrot.lane.b32.xlu0 %v439_v47, %s802_s9  ;;  %p744_p6 = scmp.ne.s32.totalorder %s742_s16, %s743_s8 }
  0xf3   : > { %p745_p9 = pnand %p744_p6, %p876_p11 }
  0xf5   : > { %p746_p13 = pneg %p745_p9 }
  0xf8   : > { %285 = vrot.lane.b32.xlu2 %v281_v27, %s803_s10  ;;  %444 = vrot.lane.b32.xlu1 %v440_v48, %s802_s9 }
  0xf9   : > { %287 = vrot.lane.b32.xlu0 %v951_v20, %s803_s10 }
 0x100   : > { %262 = vrot.lane.b32.xlu2 %v955_v23, %s804_s11  ;;  %283 = vrot.lane.b32.xlu1 %v280_v26, %s803_s10  ;;  %v805_v26 = vmov 0  }
 0x101   : > { %264 = vrot.lane.b32.xlu0 %v938_v13, %s804_s11  ;;  %695 = vset.pattern.permute.xlu1 %v805_v26 }
 0x102   : > { %696 = vset.pattern.permute.xlu0 %v805_v26 }
 0x108   : > { %260 = vrot.lane.b32.xlu1 %v953_v22, %s804_s11  ;;  %s747_s11 = scalar_lea.hbm %s1051_s3, 32 }
 0x109   : > { %p749_p1 = scmp.lt.s32.totalorder %s747_s11, %s743_s8 }
 0x10b   : > { %p750_p3 = por %p749_p1, %p748_p0 }
 0x10d   : > { %p751_p4 = pnand %p750_p3, %p746_p13 }
 0x110   : > { %471 = vperm.xlu1 %695, %v468_v15  }
 0x122   : > { %v311_v49 = vpop.permute.xlu2 %310 }
 0x12a   : > { %v342_v50 = vpop.permute.xlu2 %341 }
 0x130   : > { %v313_v51 = vpop.permute.xlu0 %312 }
 0x131   : > { %v316_v52 = vsel %vm314_vm8, %v311_v49, %v313_v51  ;;  %v457_v51 = vld [vmem:[%s1049_s1] sm:$0xff] }
 0x132   : > { %v320_v53 = vsel %vm942_vm7, 0.0, %v316_v52  ;;  %v363_v54 = vpop.permute.xlu2 %362 }
 0x133   : > { %v324_v55 = vrot.slane %v320_v53, 4 }
 0x135   : > { %328 = vst [vmem:[#allocation3 + $0x10] sm:$0xf0] %v324_v55 }
 0x138   : > { %v344_v56 = vpop.permute.xlu0 %343 }
 0x139   : > { %v347_v57 = vsel %vm345_vm9, %v342_v50, %v344_v56 }
 0x13a   : > { %351 = vst [vmem:[#allocation3 + $0x28] sm:$0xf] %v347_v57  ;;  %v309_v59 = vpop.permute.xlu1 %308  ;;  %v365_v60 = vpop.permute.xlu2 %364 }
 0x13b   : > { %v315_v61 = vsel %vm314_vm8, %v309_v59, %v311_v49  ;;  %v369_v62 = vsel %vm368_vm10, %v363_v54, %v365_v60 }
 0x13c   : > { %v319_v63 = vsel %vm934_vm6, 0.0, %v315_v61  ;;  %v373_v0 = vsel %vm973_vm11, 0.0, %v369_v62 }
 0x13d   : > { %v323_v1 = vrot.slane %v319_v63, 4  ;;  %v377_v2 = vrot.slane %v373_v0, 4 }
 0x13f   : > { %327 = vst [vmem:[#allocation3 + $0x18] sm:$0xf0] %v323_v1 }
 0x140   : > { %381 = vst [vmem:[#allocation3 + $0x48] sm:$0xf0] %v377_v2  ;;  %v367_v4 = vpop.permute.xlu0 %366 }
 0x141   : > { %v370_v5 = vsel %vm368_vm10, %v365_v60, %v367_v4 }
 0x142   : > { %v374_v6 = vsel %vm984_vm12, 0.0, %v370_v5  ;;  %v340_v7 = vpop.permute.xlu1 %339  ;;  %v396_v13 = vpop.permute.xlu2 %395 }
 0x143   : > { %v378_v9 = vrot.slane %v374_v6, 4  ;;  %v346_v10 = vsel %vm345_vm9, %v340_v7, %v342_v50 }
 0x144   : > { %350 = vst [vmem:[#allocation3 + $0x48] sm:$0xf] %v346_v10 }
 0x145   : > { %382 = vst [vmem:[#allocation3 + $0x28] sm:$0xf0] %v378_v9 }
 0x148   : > { %v398_v8 = vpop.permute.xlu0 %397 }
 0x149   : > { %v401_v11 = vsel %vm399_vm13, %v396_v13, %v398_v8 }
 0x14a   : > { %v405_v14 = vsel %vm942_vm7, 0.0, %v401_v11  ;;  %v422_v16 = vpop.permute.xlu2 %421 }
 0x14b   : > { %407 = vst [vmem:[#allocation3 + $0x20] sm:$0xf] %v405_v14  ;;  %v462_v45 = vld [vmem:[#allocation3 + $0x48] sm:$0xff] }
 0x14c   : > { %v463_v46 = vld [vmem:[#allocation3 + $0x28] sm:$0xff] }
 0x150   : > { %v424_v17 = vpop.permute.xlu0 %423 }
 0x151   : > { %v427_v18 = vsel %vm425_vm14, %v422_v16, %v424_v17 }
 0x152   : > { %431 = vst [vmem:[#allocation3 + $0x20] sm:$0xf0] %v427_v18  ;;  %v394_v19 = vpop.permute.xlu1 %393  ;;  %v286_v27 = vpop.permute.xlu2 %285 }
 0x153   : > { %v400_v20 = vsel %vm399_vm13, %v394_v19, %v396_v13 }
 0x154   : > { %v404_v21 = vsel %vm934_vm6, 0.0, %v400_v20 }
 0x155   : > { %406 = vst [vmem:[#allocation3 + $0x8] sm:$0xf] %v404_v21 }
 0x159   : > { %v465_v44 = vld [vmem:[#allocation3 + $0x20] sm:$0xff] }
 0x15a   : > { %v447_v22 = vpop.permute.xlu1 %446  ;;  %v263_v36 = vpop.permute.xlu2 %262 }
 0x162   : > { %v420_v23 = vpop.permute.xlu1 %419 }
 0x163   : > { %v426_v24 = vsel %vm425_vm14, %v420_v23, %v422_v16  ;;  %v443_v25 = vpop.permute.xlu0 %442 }
 0x164   : > { %430 = vst [vmem:[#allocation3 + $0x8] sm:$0xf0] %v426_v24 }
 0x16a   : > { %v445_v28 = vpop.permute.xlu1 %444 }
 0x16b   : > { %v449_v12 = vsel %vm448_vm15, %v443_v25, %v445_v28  ;;  %v450_v29 = vsel %vm448_vm15, %v445_v28, %v447_v22  ;;  %v288_v30 = vpop.permute.xlu0 %287  ;;  %v464_v43 = vld [vmem:[#allocation3 + $0x8] sm:$0xff] }
 0x16c   : > { %v453_v31 = vsel %vm973_vm11, 0.0, %v449_v12  ;;  %v454_v32 = vsel %vm984_vm12, 0.0, %v450_v29  ;;  %v291_v33 = vsel %vm289_vm0, %v286_v27, %v288_v30 }
 0x16d   : > { %455 = vst [vmem:[#allocation3 + $0x40] sm:$0xf] %v453_v31  ;;  %v295_v34 = vsel %vm984_vm12, 0.0, %v291_v33 }
 0x16e   : > { %456 = vst [vmem:[#allocation3 + $0x38] sm:$0xf] %v454_v32 }
 0x16f   : > { %297 = vst [vmem:[#allocation3 + $0x10] sm:$0xf] %v295_v34 }
 0x172   : > { %v284_v35 = vpop.permute.xlu1 %283 }
 0x173   : > { %v290_v37 = vsel %vm289_vm0, %v284_v35, %v286_v27  ;;  %v265_v38 = vpop.permute.xlu0 %264 }
 0x174   : > { %v294_v39 = vsel %vm973_vm11, 0.0, %v290_v37  ;;  %v268_v40 = vsel %vm266_vm1, %v263_v36, %v265_v38  ;;  %v466_v41 = vld [vmem:[#allocation3 + $0x40] sm:$0xf] }
 0x175   : > { %296 = vst [vmem:[#allocation3 + $0x18] sm:$0xf] %v294_v39  ;;  %627 = vmatpush.msk.msra.mxu0 %vm478_vm2, %v466_v41  ;;  %v467_v42 = vld [vmem:[#allocation3 + $0x38] sm:$0xf] }
 0x176   : > { %272 = vst [vmem:[#allocation3] sm:$0xf0] %v268_v40  ;;  %629 = vmatpush.msk.msra.mxu1 %vm478_vm2, %v467_v42  ;;  %v461_v49 = vld [vmem:[#allocation3 + $0x10] sm:$0xff] }
 0x177   : > { %497 = vmatpush.msra.mxu0 %v464_v43 }
 0x178   : > { %517 = vmatpush.msra.mxu1 %v465_v44 }
 0x179   : > { %498 = vmatpush.msra.mxu0 %v462_v45 }
 0x17a   : > { %518 = vmatpush.msra.mxu1 %v463_v46  ;;  %v261_v47 = vpop.permute.xlu1 %260 }
 0x17b   : > { %v267_v48 = vsel %vm266_vm1, %v261_v47, %v263_v36 }
 0x17c   : > { %271 = vst [vmem:[#allocation3 + $0x30] sm:$0xf0] %v267_v48  ;;  %519 = vmatpush.msra.mxu1 %v461_v49  ;;  %v460_v50 = vld [vmem:[#allocation3 + $0x18] sm:$0xff] }
 0x17d   : > { %499 = vmatpush.msra.mxu0 %v460_v50  ;;  %v459_v52 = vld [vmem:[#allocation3] sm:$0xff] }
 0x17e   : > { %520 = vmatpush.msra.mxu1 %v459_v52 }
 0x17f   : > { %630 = vmatmul.msk.f32.vlgmr.msra.gmra.mxu1 %vm474_vm3, %v457_v51 }
 0x182   : > { %v472_v54 = vpop.permute.xlu1 %471 }
 0x183   : > { %v458_v53 = vld [vmem:[#allocation3 + $0x30] sm:$0xff] }
 0x184   : > { %500 = vmatpush.msra.mxu0 %v458_v53 }
 0x185   : > { %628 = vmatmul.msk.f32.vlgmr.msra.gmra.mxu0 %vm474_vm3, %v457_v51 }
 0x1fc   : > { %v522_v55 = vpop.f32.mrf.mxu1 }
 0x1fd   : > { %v523_v56 = vadd.f32 %v522_v55, %v472_v54 }
 0x1ff   : > { %v526_v57 = vmul.f32 0.01, %v523_v56 }
 0x201   : > { %v528_v58 = vmax.f32 %v523_v56, %v526_v57 }
 0x202   : > { %v502_v59 = vpop.f32.mrf.mxu0 }
 0x203   : > { %530 = vst [vmem:[%s188_s23 + $0x8] sm:$0xff] %v528_v58  ;;  %v503_v60 = vadd.f32 %v502_v59, %v472_v54 }
 0x205   : > { %v525_v61 = vmul.f32 0.01, %v503_v60 }
 0x207   : > { %v527_v62 = vmax.f32 %v503_v60, %v525_v61 }
 0x209   : > { %529 = vst [vmem:[%s188_s23] sm:$0xff] %v527_v62 }
 0x20a   : > { %754 = shalt.err (!%p751_p4)
}
 0x20b   : > { %640 = dma.vmem_to_hbm [thread:$0]  (%p876_p11), %s546_s5, 256, %s548_s6, %s532_s7  }
 0x20c PF: > { %s559_s26 = sand.u32 1, %s781_s12   ;;  %p1065_p7 = scmp.ge.s32.totalorder %s793_s15, 2 }
 0x20d   : > { %s560_s20 = scalar_lea.sflag [#allocation6], %s559_s26 }
 0x20e   : > { %p647_p5 = pnand %p1065_p7, %p880_p12 }
 0x210   : > { %p648_p8 = pneg %p647_p5 }
 0x212   : > { %776 = dma.done.wait (%p648_p8), %s560_s20, 256  }
 0x213   : > { %778 = vsyncadd (%p648_p8), %s560_s20, 4294967040  ;;  %p16_p10 = scmp.ge.s32.totalorder %s851_s18, 4   ;;  %s1066_s12 = smov %s785_s13 }
 0x214   : > { %s1067_s13 = smov %s789_s14  ;;  %s1068_s14 = smov %s863_s21 }
 0x215   : > { %s1069_s15 = smov %s851_s18  ;;  %18 = sbr.rel (!%p16_p10) target bundleno = 5 (0x5), region = 87 }
 0x21a   :  { %566 = vsyncpa [#allocation5], 1 }
 0x21b   :  { %568 = vsyncpa [#allocation5 + $0x1], 1 }
 0x21c   :  { %569 = vsyncpa [#allocation6], 1 }
 0x21d   :  { %571 = vsyncpa [#allocation6 + $0x1], 1 }

</bundles_post_ra>
